<compile_context>
chip_gen: v5e
topology: v5e:2x2
jax: 0.10.0
libtpu: 0.0.40
codegen_flags: <defaults>
</compile_context>

<pallas_src>
import functools

import jax
import jax.numpy as jnp
from jax.experimental import pallas as pl
from jax.experimental.pallas import tpu as pltpu


LANE = 128


def _round_up(x: int, m: int) -> int:
    return ((x + m - 1) // m) * m


def _select_batch_tiling(B: int, max_tile: int):
    """Pick (TB, B_pad) bounding padding waste (all Python ints, trace-time)."""
    if B <= max_tile:
        tb = _round_up(B, 8)
        return tb, tb
    candidates = [t for t in (1024, 512, 256, 128) if t <= max_tile]
    if not candidates:
        candidates = [_round_up(max_tile, 8)]
    best = None  # (waste, -tb, tb, b_pad)
    for tb in candidates:
        b_pad = _round_up(B, tb)
        key = (b_pad - B, -tb)
        if best is None or key < best[0]:
            best = (key, tb, b_pad)
    _, tb, b_pad = best
    return tb, b_pad


def critic_kernel(s_ref, a_ref,
                  w1s_ref, w1a_ref, b14_ref,
                  w2_ref, b2_ref, w5_ref, b5_ref,
                  wq1_ref, wq2_ref, bq_ref,
                  q_ref):
    bf16 = jnp.bfloat16
    f32 = jnp.float32

    s = s_ref[...].astype(bf16)
    a = a_ref[...].astype(bf16)

    # ---- Layer 1 of both critics, stacked along the output lanes ----
    # hg[:, :H_pad]  = relu(x @ W1 + b1)   (critic 1)
    # hg[:, H_pad:]  = relu(x @ W4 + b4)   (critic 2)
    hg = (jnp.dot(s, w1s_ref[...], preferred_element_type=f32)
          + jnp.dot(a, w1a_ref[...], preferred_element_type=f32)
          + b14_ref[...])
    hg = jnp.maximum(hg, 0.0)

    H_pad = w2_ref.shape[0]                      # static, 128-multiple
    h = hg[:, :H_pad].astype(bf16)               # free lane slice
    g = hg[:, H_pad:].astype(bf16)

    # ---- Layer 2 (separate per critic; block-diag merge would double FLOPs) ----
    h2 = jnp.maximum(
        jnp.dot(h, w2_ref[...], preferred_element_type=f32) + b2_ref[...],
        0.0).astype(bf16)
    g2 = jnp.maximum(
        jnp.dot(g, w5_ref[...], preferred_element_type=f32) + b5_ref[...],
        0.0).astype(bf16)

    # ---- Heads: both Q values land in one lane-dense 128-wide slab ----
    # wq1 has l3's column at lane 0, wq2 has l6's column at lane 1.
    q_ref[...] = (jnp.dot(h2, wq1_ref[...], preferred_element_type=f32)
                  + jnp.dot(g2, wq2_ref[...], preferred_element_type=f32)
                  + bq_ref[...]).astype(q_ref.dtype)


def _place(x, rows, cols, row_off=0, col_off=0, dtype=jnp.float32):
    """Zero slab (rows, cols) with x placed at (row_off, col_off)."""
    out = jnp.zeros((rows, cols), jnp.float32)
    out = out.at[row_off:row_off + x.shape[0],
                 col_off:col_off + x.shape[1]].set(x.astype(jnp.float32))
    return out.astype(dtype)


def prepare_critic_params(params, state_dim: int):
    """One-time (outside jitted forward) padding / stacking / bf16 cast.

    Weights in `params` are stored transposed: (in_features, out_features).
    """
    S = state_dim
    H = params["w1"].shape[1]
    A = params["w1"].shape[0] - S
    H_pad = _round_up(H, LANE)
    Q_pad = LANE
    bf16 = jnp.bfloat16

    w1, w4 = params["w1"], params["w4"]
    # First-layer state/action halves, stacked across the two critics.
    w1s = jnp.concatenate([_place(w1[:S], S, H_pad),
                           _place(w4[:S], S, H_pad)], axis=1).astype(bf16)
    w1a = jnp.concatenate([_place(w1[S:], A, H_pad),
                           _place(w4[S:], A, H_pad)], axis=1).astype(bf16)
    b14 = jnp.concatenate([_place(params["b1"], 1, H_pad),
                           _place(params["b4"], 1, H_pad)], axis=1)
    # Middle layers.
    w2 = _place(params["w2"], H_pad, H_pad, dtype=bf16)
    w5 = _place(params["w5"], H_pad, H_pad, dtype=bf16)
    b2 = _place(params["b2"], 1, H_pad)
    b5 = _place(params["b5"], 1, H_pad)
    # Heads: q1 column at lane 0, q2 column at lane 1 of one 128-lane slab.
    wq1 = _place(params["w3"], H_pad, Q_pad, col_off=0, dtype=bf16)
    wq2 = _place(params["w6"], H_pad, Q_pad, col_off=1, dtype=bf16)
    bq = (jnp.zeros((1, Q_pad), jnp.float32)
          .at[:, 0:1].set(params["b3"].astype(jnp.float32))
          .at[:, 1:2].set(params["b6"].astype(jnp.float32)))

    return {"w1s": w1s, "w1a": w1a, "b14": b14,
            "w2": w2, "b2": b2, "w5": w5, "b5": b5,
            "wq1": wq1, "wq2": wq2, "bq": bq}


@functools.partial(jax.jit, static_argnames=("max_batch_tile",))
def critic_forward(state, action, prepped, *, max_batch_tile: int = 512):
    """state: (B, S) f32, action: (B, A) f32; prepped from prepare_critic_params.
    Returns (q1, q2), each (B, 1) f32."""
    B, S = state.shape
    _, A = action.shape
    H_pad = prepped["w2"].shape[0]
    H2 = prepped["w1s"].shape[1]          # 2 * H_pad
    Q_pad = prepped["wq1"].shape[1]       # 128

    TB, B_pad = _select_batch_tiling(B, max_batch_tile)
    n_blocks = B_pad // TB

    f32 = jnp.float32
    state_p = jnp.pad(state.astype(f32), ((0, B_pad - B), (0, 0)))
    action_p = jnp.pad(action.astype(f32), ((0, B_pad - B), (0, 0)))

    batch_spec = lambda cols: pl.BlockSpec((TB, cols), lambda i: (i, 0))
    resident = lambda shape: pl.BlockSpec(shape, lambda i: (0, 0))

    # Rough VMEM working-set estimate; only raise the scoped limit if needed.
    bfb, f4 = 2, 4
    weight_bytes = (S * H2 * bfb + A * H2 * bfb + 2 * H_pad * H_pad * bfb
                    + 2 * H_pad * Q_pad * bfb + (H2 + 2 * H_pad + Q_pad) * f4)
    stream_bytes = TB * (S + A) * f4 + TB * Q_pad * f4
    live_bytes = TB * (H2 + 2 * H_pad) * f4
    vmem_est = int(1.25 * (2 * (weight_bytes + stream_bytes) + live_bytes))
    vmem_limit = min(vmem_est, 120 << 20) if vmem_est > (32 << 20) else None

    q = pl.pallas_call(
        critic_kernel,
        out_shape=jax.ShapeDtypeStruct((B_pad, Q_pad), f32),
        grid=(n_blocks,),
        in_specs=[
            batch_spec(S), batch_spec(A),
            resident((S, H2)), resident((A, H2)), resident((1, H2)),
            resident((H_pad, H_pad)), resident((1, H_pad)),
            resident((H_pad, H_pad)), resident((1, H_pad)),
            resident((H_pad, Q_pad)), resident((H_pad, Q_pad)),
            resident((1, Q_pad)),
        ],
        out_specs=batch_spec(Q_pad),
        compiler_params=pltpu.CompilerParams(
            dimension_semantics=("parallel",),
            vmem_limit_bytes=vmem_limit),
    )(state_p, action_p,
      prepped["w1s"], prepped["w1a"], prepped["b14"],
      prepped["w2"], prepped["b2"], prepped["w5"], prepped["b5"],
      prepped["wq1"], prepped["wq2"], prepped["bq"])

    return q[:B, 0:1], q[:B, 1:2]


def init_critic_params(key, state_dim, action_dim, hidden_dim):
    """Deterministic init mimicking nn.Linear's U(-1/sqrt(fan_in), ...).
    Weights stored transposed: (in_features, out_features)."""
    ks = jax.random.split(key, 12)

    def linear(kw, kb, fan_in, fan_out):
        bound = 1.0 / jnp.sqrt(jnp.float32(fan_in))
        w = jax.random.uniform(kw, (fan_in, fan_out), jnp.float32, -bound, bound)
        b = jax.random.uniform(kb, (1, fan_out), jnp.float32, -bound, bound)
        return w, b

    sa = state_dim + action_dim
    w1, b1 = linear(ks[0], ks[1], sa, hidden_dim)
    w2, b2 = linear(ks[2], ks[3], hidden_dim, hidden_dim)
    w3, b3 = linear(ks[4], ks[5], hidden_dim, 1)
    w4, b4 = linear(ks[6], ks[7], sa, hidden_dim)
    w5, b5 = linear(ks[8], ks[9], hidden_dim, hidden_dim)
    w6, b6 = linear(ks[10], ks[11], hidden_dim, 1)
    return {"w1": w1, "b1": b1, "w2": w2, "b2": b2, "w3": w3, "b3": b3,
            "w4": w4, "b4": b4, "w5": w5, "b5": b5, "w6": w6, "b6": b6}


if __name__ == "__main__":
    batch = 2
    state_dim = 16
    action_dim = 8
    hidden_dim = 32

    key = jax.random.PRNGKey(0)
    k_params, k_state, k_action = jax.random.split(key, 3)

    params = init_critic_params(k_params, state_dim, action_dim, hidden_dim)
    prepped = prepare_critic_params(params, state_dim)

    state = jax.random.normal(k_state, (batch, state_dim), jnp.float32)
    action = jax.random.normal(k_action, (batch, action_dim), jnp.float32)

    q1, q2 = critic_forward(state, action, prepped)
    q1, q2 = jax.block_until_ready((q1, q2))

    # Pure-JAX f32 reference of the same Critic math (concat form).
    x = jnp.concatenate([state, action], axis=-1)
    r1 = jnp.maximum(x @ params["w1"] + params["b1"], 0.0)
    r1 = jnp.maximum(r1 @ params["w2"] + params["b2"], 0.0)
    r1 = r1 @ params["w3"] + params["b3"]
    r2 = jnp.maximum(x @ params["w4"] + params["b4"], 0.0)
    r2 = jnp.maximum(r2 @ params["w5"] + params["b5"], 0.0)
    r2 = r2 @ params["w6"] + params["b6"]

    assert q1.shape == (batch, 1) and q2.shape == (batch, 1)
    # bf16 MXU operands with f32 accumulation -> loosened tolerance vs f32 ref.
    assert jnp.allclose(q1, r1, atol=5e-2, rtol=5e-2)
    assert jnp.allclose(q2, r2, atol=5e-2, rtol=5e-2)

    print("KERNEL_OK")
</pallas_src>

<mosaic_0001>
module attributes {stable_mosaic.version = 11 : i64} {
  func.func @critic_kernel(%arg0: i32, %arg1: memref<8x16xf32, #tpu.memory_space<vmem>>, %arg2: memref<8x8xf32, #tpu.memory_space<vmem>>, %arg3: memref<16x256xbf16, #tpu.memory_space<vmem>>, %arg4: memref<8x256xbf16, #tpu.memory_space<vmem>>, %arg5: memref<1x256xf32, #tpu.memory_space<vmem>>, %arg6: memref<128x128xbf16, #tpu.memory_space<vmem>>, %arg7: memref<1x128xf32, #tpu.memory_space<vmem>>, %arg8: memref<128x128xbf16, #tpu.memory_space<vmem>>, %arg9: memref<1x128xf32, #tpu.memory_space<vmem>>, %arg10: memref<128x128xbf16, #tpu.memory_space<vmem>>, %arg11: memref<128x128xbf16, #tpu.memory_space<vmem>>, %arg12: memref<1x128xf32, #tpu.memory_space<vmem>>, %arg13: memref<8x128xf32, #tpu.memory_space<vmem>>) attributes {dimension_semantics = [#tpu.dimension_semantics<parallel>], iteration_bounds = array<i64: 1>, scalar_prefetch = 0 : i64, scratch_operands = 0 : i64, tpu.core_type = #tpu.core_type<tc>, window_params = [{transform_indices = @transform_0, window_bounds = array<i64: 8, 16>}, {transform_indices = @transform_1, window_bounds = array<i64: 8, 8>}, {pipeline_mode = #tpu.pipeline_mode<synchronous>, transform_indices = @transform_2, window_bounds = array<i64: 16, 256>}, {pipeline_mode = #tpu.pipeline_mode<synchronous>, transform_indices = @transform_3, window_bounds = array<i64: 8, 256>}, {pipeline_mode = #tpu.pipeline_mode<synchronous>, transform_indices = @transform_4, window_bounds = array<i64: 1, 256>}, {pipeline_mode = #tpu.pipeline_mode<synchronous>, transform_indices = @transform_5, window_bounds = array<i64: 128, 128>}, {pipeline_mode = #tpu.pipeline_mode<synchronous>, transform_indices = @transform_6, window_bounds = array<i64: 1, 128>}, {pipeline_mode = #tpu.pipeline_mode<synchronous>, transform_indices = @transform_7, window_bounds = array<i64: 128, 128>}, {pipeline_mode = #tpu.pipeline_mode<synchronous>, transform_indices = @transform_8, window_bounds = array<i64: 1, 128>}, {pipeline_mode = #tpu.pipeline_mode<synchronous>, transform_indices = @transform_9, window_bounds = array<i64: 128, 128>}, {pipeline_mode = #tpu.pipeline_mode<synchronous>, transform_indices = @transform_10, window_bounds = array<i64: 128, 128>}, {pipeline_mode = #tpu.pipeline_mode<synchronous>, transform_indices = @transform_11, window_bounds = array<i64: 1, 128>}, {transform_indices = @transform_12, window_bounds = array<i64: 8, 128>}]} {
    %c0 = arith.constant 0 : index
    %c0_0 = arith.constant 0 : index
    %0 = vector.load %arg1[%c0, %c0_0] : memref<8x16xf32, #tpu.memory_space<vmem>>, vector<8x16xf32>
    %1 = arith.truncf %0 : vector<8x16xf32> to vector<8x16xbf16>
    %c0_1 = arith.constant 0 : index
    %c0_2 = arith.constant 0 : index
    %2 = vector.load %arg2[%c0_1, %c0_2] : memref<8x8xf32, #tpu.memory_space<vmem>>, vector<8x8xf32>
    %3 = arith.truncf %2 : vector<8x8xf32> to vector<8x8xbf16>
    %c0_3 = arith.constant 0 : index
    %c0_4 = arith.constant 0 : index
    %4 = vector.load %arg3[%c0_3, %c0_4] : memref<16x256xbf16, #tpu.memory_space<vmem>>, vector<16x256xbf16>
    %cst = arith.constant dense<0.000000e+00> : vector<8x256xf32>
    %5 = tpu.matmul %1, %4, %cst {dimension_numbers = #tpu.dot_dimension_numbers<[1], [0], [0], [1], [0, 0, 1, 1], [], []>} : vector<8x16xbf16>, vector<16x256xbf16>, vector<8x256xf32> -> vector<8x256xf32>
    %c0_5 = arith.constant 0 : index
    %c0_6 = arith.constant 0 : index
    %6 = vector.load %arg4[%c0_5, %c0_6] : memref<8x256xbf16, #tpu.memory_space<vmem>>, vector<8x256xbf16>
    %cst_7 = arith.constant dense<0.000000e+00> : vector<8x256xf32>
    %7 = tpu.matmul %3, %6, %cst_7 {dimension_numbers = #tpu.dot_dimension_numbers<[1], [0], [0], [1], [0, 0, 1, 1], [], []>} : vector<8x8xbf16>, vector<8x256xbf16>, vector<8x256xf32> -> vector<8x256xf32>
    %8 = arith.addf %5, %7 : vector<8x256xf32>
    %c0_8 = arith.constant 0 : index
    %c0_9 = arith.constant 0 : index
    %9 = vector.load %arg5[%c0_8, %c0_9] : memref<1x256xf32, #tpu.memory_space<vmem>>, vector<1x256xf32>
    %10 = vector.broadcast %9 : vector<1x256xf32> to vector<8x256xf32>
    %11 = arith.addf %8, %10 : vector<8x256xf32>
    %cst_10 = arith.constant 0.000000e+00 : f32
    %12 = vector.broadcast %cst_10 : f32 to vector<8x256xf32>
    %13 = arith.maximumf %11, %12 : vector<8x256xf32>
    %14 = vector.extract_strided_slice %13 {offsets = [0, 0], sizes = [8, 128], strides = [1, 1]} : vector<8x256xf32> to vector<8x128xf32>
    %15 = arith.truncf %14 : vector<8x128xf32> to vector<8x128xbf16>
    %16 = vector.extract_strided_slice %13 {offsets = [0, 128], sizes = [8, 128], strides = [1, 1]} : vector<8x256xf32> to vector<8x128xf32>
    %17 = arith.truncf %16 : vector<8x128xf32> to vector<8x128xbf16>
    %c0_11 = arith.constant 0 : index
    %c0_12 = arith.constant 0 : index
    %18 = vector.load %arg6[%c0_11, %c0_12] : memref<128x128xbf16, #tpu.memory_space<vmem>>, vector<128x128xbf16>
    %cst_13 = arith.constant dense<0.000000e+00> : vector<8x128xf32>
    %19 = tpu.matmul %15, %18, %cst_13 {dimension_numbers = #tpu.dot_dimension_numbers<[1], [0], [0], [1], [0, 0, 1, 1], [], []>} : vector<8x128xbf16>, vector<128x128xbf16>, vector<8x128xf32> -> vector<8x128xf32>
    %c0_14 = arith.constant 0 : index
    %c0_15 = arith.constant 0 : index
    %20 = vector.load %arg7[%c0_14, %c0_15] : memref<1x128xf32, #tpu.memory_space<vmem>>, vector<1x128xf32>
    %21 = vector.broadcast %20 : vector<1x128xf32> to vector<8x128xf32>
    %22 = arith.addf %19, %21 : vector<8x128xf32>
    %cst_16 = arith.constant 0.000000e+00 : f32
    %23 = vector.broadcast %cst_16 : f32 to vector<8x128xf32>
    %24 = arith.maximumf %22, %23 : vector<8x128xf32>
    %25 = arith.truncf %24 : vector<8x128xf32> to vector<8x128xbf16>
    %c0_17 = arith.constant 0 : index
    %c0_18 = arith.constant 0 : index
    %26 = vector.load %arg8[%c0_17, %c0_18] : memref<128x128xbf16, #tpu.memory_space<vmem>>, vector<128x128xbf16>
    %cst_19 = arith.constant dense<0.000000e+00> : vector<8x128xf32>
    %27 = tpu.matmul %17, %26, %cst_19 {dimension_numbers = #tpu.dot_dimension_numbers<[1], [0], [0], [1], [0, 0, 1, 1], [], []>} : vector<8x128xbf16>, vector<128x128xbf16>, vector<8x128xf32> -> vector<8x128xf32>
    %c0_20 = arith.constant 0 : index
    %c0_21 = arith.constant 0 : index
    %28 = vector.load %arg9[%c0_20, %c0_21] : memref<1x128xf32, #tpu.memory_space<vmem>>, vector<1x128xf32>
    %29 = vector.broadcast %28 : vector<1x128xf32> to vector<8x128xf32>
    %30 = arith.addf %27, %29 : vector<8x128xf32>
    %cst_22 = arith.constant 0.000000e+00 : f32
    %31 = vector.broadcast %cst_22 : f32 to vector<8x128xf32>
    %32 = arith.maximumf %30, %31 : vector<8x128xf32>
    %33 = arith.truncf %32 : vector<8x128xf32> to vector<8x128xbf16>
    %c0_23 = arith.constant 0 : index
    %c0_24 = arith.constant 0 : index
    %34 = vector.load %arg10[%c0_23, %c0_24] : memref<128x128xbf16, #tpu.memory_space<vmem>>, vector<128x128xbf16>
    %cst_25 = arith.constant dense<0.000000e+00> : vector<8x128xf32>
    %35 = tpu.matmul %25, %34, %cst_25 {dimension_numbers = #tpu.dot_dimension_numbers<[1], [0], [0], [1], [0, 0, 1, 1], [], []>} : vector<8x128xbf16>, vector<128x128xbf16>, vector<8x128xf32> -> vector<8x128xf32>
    %c0_26 = arith.constant 0 : index
    %c0_27 = arith.constant 0 : index
    %36 = vector.load %arg11[%c0_26, %c0_27] : memref<128x128xbf16, #tpu.memory_space<vmem>>, vector<128x128xbf16>
    %cst_28 = arith.constant dense<0.000000e+00> : vector<8x128xf32>
    %37 = tpu.matmul %33, %36, %cst_28 {dimension_numbers = #tpu.dot_dimension_numbers<[1], [0], [0], [1], [0, 0, 1, 1], [], []>} : vector<8x128xbf16>, vector<128x128xbf16>, vector<8x128xf32> -> vector<8x128xf32>
    %38 = arith.addf %35, %37 : vector<8x128xf32>
    %c0_29 = arith.constant 0 : index
    %c0_30 = arith.constant 0 : index
    %39 = vector.load %arg12[%c0_29, %c0_30] : memref<1x128xf32, #tpu.memory_space<vmem>>, vector<1x128xf32>
    %40 = vector.broadcast %39 : vector<1x128xf32> to vector<8x128xf32>
    %41 = arith.addf %38, %40 : vector<8x128xf32>
    %c0_31 = arith.constant 0 : index
    %c0_32 = arith.constant 0 : index
    %42 = vector.load %arg13[%c0_31, %c0_32] : memref<8x128xf32, #tpu.memory_space<vmem>>, vector<8x128xf32>
    tpu.vector_store %arg13[%c0_31, %c0_32], %41 {strides = array<i32>} : memref<8x128xf32, #tpu.memory_space<vmem>>, vector<8x128xf32>,
    return
  }
  func.func @transform_0(%arg0: i32) -> (i32, i32) {
    %c0_i32 = arith.constant 0 : i32
    %c0_i32_0 = arith.constant 0 : i32
    return %arg0, %c0_i32 : i32, i32
  }
  func.func @transform_1(%arg0: i32) -> (i32, i32) {
    %c0_i32 = arith.constant 0 : i32
    %c0_i32_0 = arith.constant 0 : i32
    return %arg0, %c0_i32 : i32, i32
  }
  func.func @transform_2(%arg0: i32) -> (i32, i32) {
    %c0_i32 = arith.constant 0 : i32
    %c0_i32_0 = arith.constant 0 : i32
    %c0_i32_1 = arith.constant 0 : i32
    return %c0_i32, %c0_i32_0 : i32, i32
  }
  func.func @transform_3(%arg0: i32) -> (i32, i32) {
    %c0_i32 = arith.constant 0 : i32
    %c0_i32_0 = arith.constant 0 : i32
    %c0_i32_1 = arith.constant 0 : i32
    return %c0_i32, %c0_i32_0 : i32, i32
  }
  func.func @transform_4(%arg0: i32) -> (i32, i32) {
    %c0_i32 = arith.constant 0 : i32
    %c0_i32_0 = arith.constant 0 : i32
    %c0_i32_1 = arith.constant 0 : i32
    return %c0_i32, %c0_i32_0 : i32, i32
  }
  func.func @transform_5(%arg0: i32) -> (i32, i32) {
    %c0_i32 = arith.constant 0 : i32
    %c0_i32_0 = arith.constant 0 : i32
    %c0_i32_1 = arith.constant 0 : i32
    return %c0_i32, %c0_i32_0 : i32, i32
  }
  func.func @transform_6(%arg0: i32) -> (i32, i32) {
    %c0_i32 = arith.constant 0 : i32
    %c0_i32_0 = arith.constant 0 : i32
    %c0_i32_1 = arith.constant 0 : i32
    return %c0_i32, %c0_i32_0 : i32, i32
  }
  func.func @transform_7(%arg0: i32) -> (i32, i32) {
    %c0_i32 = arith.constant 0 : i32
    %c0_i32_0 = arith.constant 0 : i32
    %c0_i32_1 = arith.constant 0 : i32
    return %c0_i32, %c0_i32_0 : i32, i32
  }
  func.func @transform_8(%arg0: i32) -> (i32, i32) {
    %c0_i32 = arith.constant 0 : i32
    %c0_i32_0 = arith.constant 0 : i32
    %c0_i32_1 = arith.constant 0 : i32
    return %c0_i32, %c0_i32_0 : i32, i32
  }
  func.func @transform_9(%arg0: i32) -> (i32, i32) {
    %c0_i32 = arith.constant 0 : i32
    %c0_i32_0 = arith.constant 0 : i32
    %c0_i32_1 = arith.constant 0 : i32
    return %c0_i32, %c0_i32_0 : i32, i32
  }
  func.func @transform_10(%arg0: i32) -> (i32, i32) {
    %c0_i32 = arith.constant 0 : i32
    %c0_i32_0 = arith.constant 0 : i32
    %c0_i32_1 = arith.constant 0 : i32
    return %c0_i32, %c0_i32_0 : i32, i32
  }
  func.func @transform_11(%arg0: i32) -> (i32, i32) {
    %c0_i32 = arith.constant 0 : i32
    %c0_i32_0 = arith.constant 0 : i32
    %c0_i32_1 = arith.constant 0 : i32
    return %c0_i32, %c0_i32_0 : i32, i32
  }
  func.func @transform_12(%arg0: i32) -> (i32, i32) {
    %c0_i32 = arith.constant 0 : i32
    %c0_i32_0 = arith.constant 0 : i32
    return %arg0, %c0_i32 : i32, i32
  }
}

</mosaic_0001>

<bundles_post_ra>
// kernel: critic_forward.1
= control target key start
LH: loop header
LB: loop body
LE: loop exit
PB: predicated region body
PF: predicated region fallthrough
CT: control target
= control target key end

     0   :  { %17 = vsyncpa [#allocation3], 0  ;;  %s1119_s0 = inlined_call_operand.vmem [shape: f32[8,16], index: 0, kind: input, shape index: {}]   ;;  %s1120_s1 = inlined_call_operand.vmem [shape: f32[8,8], index: 1, kind: input, shape index: {}]   ;;  %s1121_s2 = inlined_call_operand.vmem [shape: bf16[16,256], index: 2, kind: input, shape index: {}]   ;;  %s1122_s3 = inlined_call_operand.vmem [shape: bf16[8,256], index: 3, kind: input, shape index: {}]   ;;  %s1123_s4 = inlined_call_operand.hbm [shape: f32[1,256], index: 4, kind: input, shape index: {}]   ;;  %s1124_s5 = inlined_call_operand.hbm [shape: bf16[128,128], index: 5, kind: input, shape index: {}]   ;;  %s1125_s6 = inlined_call_operand.hbm [shape: f32[1,128], index: 6, kind: input, shape index: {}]   ;;  %s1126_s7 = inlined_call_operand.hbm [shape: bf16[128,128], index: 7, kind: input, shape index: {}]   ;;  %s1127_s8 = inlined_call_operand.hbm [shape: f32[1,128], index: 8, kind: input, shape index: {}]   ;;  %s1128_s9 = inlined_call_operand.hbm [shape: bf16[128,128], index: 9, kind: input, shape index: {}]   ;;  %s1129_s10 = inlined_call_operand.hbm [shape: bf16[128,128], index: 10, kind: input, shape index: {}]   ;;  %s1130_s11 = inlined_call_operand.hbm [shape: f32[1,128], index: 11, kind: input, shape index: {}]   ;;  %s1131_s12 = inlined_call_operand.vmem [shape: f32[8,128], index: 12, kind: output, shape index: {}]  }
   0x1   :  { %18 = vsyncpa [#allocation5], 0 }
   0x2   :  { %19 = vsyncpa [#allocation8], 0 }
   0x3   :  { %20 = vsyncpa [#allocation11], 0  ;;  %s45_s23 = sshll.u32 %s1124_s5, 4  ;;  %s46_s23 = int_to_ptr.hbm [resolvable:$true] %s45_s23 }
   0x4   :  { %21 = vsyncpa [#allocation14], 0  ;;  %s984_s24 = smov [#allocation4]   ;;  %s69_s28 = sshll.u32 %s1126_s7, 4  ;;  %s70_s28 = int_to_ptr.hbm [resolvable:$true] %s69_s28 }
   0x5   :  { %s47_s25 = sshll.u32 %s984_s24, 4  ;;  %s985_s29 = smov 64   ;;  %s48_s25 = int_to_ptr.vmem [resolvable:$true] %s47_s25 }
   0x6   :  { %s986_s30 = smov 4   ;;  %s987_s13 = smov [#allocation7]  }
   0x7   :  { %53 = dma.hbm_to_vmem [thread:$0]  %s46_s23, 1024, %s48_s25, [#allocation5], %s985_s29, %s985_s29, %s986_s30  }
   0x8   :  { %s71_s14 = sshll.u32 %s987_s13, 4  ;;  %s93_s16 = sshll.u32 %s1128_s9, 4  ;;  %s72_s14 = int_to_ptr.vmem [resolvable:$true] %s71_s14  ;;  %s94_s16 = int_to_ptr.hbm [resolvable:$true] %s93_s16 }
   0x9   :  { %77 = dma.hbm_to_vmem [thread:$0]  %s70_s28, 1024, %s72_s14, [#allocation8], %s985_s29, %s985_s29, %s986_s30  }
   0xa   :  { %s35_s18 = sshll.u32 %s1123_s4, 4  ;;  %s988_s19 = smov [#allocation10]   ;;  %s36_s18 = int_to_ptr.hbm [resolvable:$true] %s35_s18 }
   0xb   :  { %s95_s20 = sshll.u32 %s988_s19, 4  ;;  %s989_s21 = smov [#allocation2]   ;;  %s96_s20 = int_to_ptr.vmem [resolvable:$true] %s95_s20 }
   0xc   :  { %101 = dma.hbm_to_vmem [thread:$0]  %s94_s16, 1024, %s96_s20, [#allocation11], %s985_s29, %s985_s29, %s986_s30  }
   0xd   :  { %s37_s9 = sshll.u32 %s989_s21, 4  ;;  %s59_s24 = sshll.u32 %s1125_s6, 4  ;;  %s38_s9 = int_to_ptr.vmem [resolvable:$true] %s37_s9  ;;  %s60_s24 = int_to_ptr.hbm [resolvable:$true] %s59_s24 }
   0xe   :  { %40 = dma.hbm_to_vmem [thread:$0]  %s36_s18, 32, %s38_s9, [#allocation3]  }
   0xf   :  { %s83_s4 = sshll.u32 %s1127_s8, 4  ;;  %s990_s27 = smov [#allocation6]   ;;  %s84_s4 = int_to_ptr.hbm [resolvable:$true] %s83_s4 }
  0x10   :  { %s61_s28 = sshll.u32 %s990_s27, 4  ;;  %s991_s13 = smov [#allocation9]   ;;  %s62_s28 = int_to_ptr.vmem [resolvable:$true] %s61_s28 }
  0x11   :  { %64 = dma.hbm_to_vmem [thread:$0]  %s60_s24, 16, %s62_s28, [#allocation5]  }
  0x12   :  { %s85_s14 = sshll.u32 %s991_s13, 4  ;;  %s106_s16 = sshll.u32 %s1129_s10, 4  ;;  %s86_s14 = int_to_ptr.vmem [resolvable:$true] %s85_s14  ;;  %s107_s16 = int_to_ptr.hbm [resolvable:$true] %s106_s16 }
  0x13   :  { %88 = dma.hbm_to_vmem [thread:$0]  %s84_s4, 16, %s86_s14, [#allocation8]  }
  0x14   :  { %s120_s17 = sshll.u32 %s1130_s11, 4  ;;  %s992_s18 = smov [#allocation12]   ;;  %s121_s17 = int_to_ptr.hbm [resolvable:$true] %s120_s17 }
  0x15   :  { %s108_s8 = sshll.u32 %s992_s18, 4  ;;  %s993_s19 = smov [#allocation13]   ;;  %s109_s8 = int_to_ptr.vmem [resolvable:$true] %s108_s8 }
  0x16   :  { %114 = dma.hbm_to_vmem [thread:$0]  %s107_s16, 1024, %s109_s8, [#allocation11], %s985_s29, %s985_s29, %s986_s30  }
  0x17   :  { %s122_s20 = sshll.u32 %s993_s19, 4  ;;  %s123_s20 = int_to_ptr.vmem [resolvable:$true] %s122_s20 }
  0x18   :  { %125 = dma.hbm_to_vmem [thread:$0]  %s121_s17, 16, %s123_s20, [#allocation14]  }
  0x19   :  { %974 = dma.done.wait [#allocation3], 32  }
  0x1a   :  { %975 = vsyncadd [#allocation3], 4294967264 }
  0x1b   :  { %976 = dma.done.wait [#allocation5], 1040  }
  0x1c   :  { %977 = vsyncadd [#allocation5], 4294966256 }
  0x1d   :  { %978 = dma.done.wait [#allocation8], 1040  }
  0x1e   :  { %979 = vsyncadd [#allocation8], 4294966256 }
  0x1f   :  { %980 = dma.done.wait [#allocation11], 2048  }
  0x20   :  { %981 = vsyncadd [#allocation11], 4294965248 }
  0x21   :  { %982 = dma.done.wait [#allocation14], 16  }
  0x22   :  { %983 = vsyncadd [#allocation14], 4294967280  ;;  %v599_v0 = vld [vmem:[%s1121_s2] sm:$0xf]  ;;  %v736_v1 = vld [vmem:[%s1121_s2 + $0x4] sm:$0xf0] }
  0x23   :  { %v735_v2 = vld [vmem:[%s1121_s2 + $0x4] sm:$0xf]  ;;  %v600_v3 = vor.u32 %v736_v1, %v599_v0  ;;  %v601_v4 = vld [vmem:[%s1121_s2 + $0x8] sm:$0xf0]  ;;  %vm175_vm0 = vcmask 1043456   ;;  %vm218_vm1 = vcmask 130048  }
  0x24   :  { %v165_v5 = vld [vmem:[%s1122_s3] sm:$0xff]  ;;  %v604_v7 = vor.u32 %v735_v2, %v601_v4  ;;  %vm171_vm2 = vcmask 64512   ;;  %v743_v19 = vld [vmem:[#allocation4 + $0x30] sm:$0xff]  ;;  %v742_v21 = vld [vmem:[#allocation4 + $0x28] sm:$0xff] }
  0x25   :  { %v159_v6 = vld [vmem:[%s1119_s0] sm:$0xff]  ;;  %v167_v8 = vunpack.c.l.b16 %v165_v5  ;;  %v168_v9 = vunpack.c.h.b16 %v165_v5  ;;  %229 = vmatpush.bf16.msra.mxu2 %v600_v3  ;;  %v751_v20 = vld [vmem:[#allocation7 + $0x30] sm:$0xff]  ;;  %v750_v22 = vld [vmem:[#allocation7 + $0x28] sm:$0xff] }
  0x26   :  { %v160_v10 = vpack.c.bf16 %v159_v6, %v159_v6  ;;  %v161_v11 = vld [vmem:[%s1120_s1] sm:$0xff]  ;;  %242 = vmatpush.bf16.msra.mxu3 %v604_v7  ;;  %v739_v27 = vld [vmem:[#allocation4 + $0x10] sm:$0xff]  ;;  %v738_v29 = vld [vmem:[#allocation4 + $0x8] sm:$0xff] }
  0x27   :  { %v169_v12 = vpack.c.b16 %v167_v8, %v167_v8  ;;  %v170_v13 = vpack.c.b16 %v168_v9, %v168_v9  ;;  %v744_v14 = vld [vmem:[#allocation4 + $0x38] sm:$0xff]  ;;  %v162_v18 = vpack.c.bf16 %v161_v11, %v161_v11  ;;  %v741_v23 = vld [vmem:[#allocation4 + $0x20] sm:$0xff]  ;;  %v746_v30 = vld [vmem:[#allocation7 + $0x8] sm:$0xff] }
  0x28   :  { %v752_v15 = vld [vmem:[#allocation7 + $0x38] sm:$0xff]  ;;  %605 = vmatmul.msk.bf16.vlgmr.msra.gmra.mxu2 %vm218_vm1, %v160_v10  ;;  %v749_v24 = vld [vmem:[#allocation7 + $0x20] sm:$0xff]  ;;  %v747_v28 = vld [vmem:[#allocation7 + $0x10] sm:$0xff] }
  0x29   :  { %v177_v16 = vsel %vm175_vm0, %v169_v12, 0  ;;  %v180_v17 = vsel %vm175_vm0, %v170_v13, 0  ;;  %606 = vmatmul.msk.bf16.vlgmr.msra.gmra.mxu3 %vm218_vm1, %v160_v10  ;;  %v740_v25 = vld [vmem:[#allocation4 + $0x18] sm:$0xff]  ;;  %v737_v31 = vld [vmem:[#allocation4] sm:$0xff]  ;;  %v766_v37 = vld [vmem:[#allocation12 + $0x28] sm:$0xff] }
  0x2a   :  { %189 = vmatpush.bf16.msra.mxu0 %v177_v16  ;;  %202 = vmatpush.bf16.msra.mxu1 %v180_v17  ;;  %v748_v26 = vld [vmem:[#allocation7 + $0x18] sm:$0xff]  ;;  %v745_v32 = vld [vmem:[#allocation7] sm:$0xff]  ;;  %v758_v38 = vld [vmem:[#allocation10 + $0x28] sm:$0xff] }
  0x2b   :  { %v768_v33 = vld [vmem:[#allocation12 + $0x38] sm:$0xff]  ;;  %v767_v35 = vld [vmem:[#allocation12 + $0x30] sm:$0xff]  ;;  %v765_v39 = vld [vmem:[#allocation12 + $0x20] sm:$0xff] }
  0x2c   :  { %v760_v34 = vld [vmem:[#allocation10 + $0x38] sm:$0xff]  ;;  %506 = vmatpush.bf16.msrb.mxu2 %v768_v33  ;;  %v759_v36 = vld [vmem:[#allocation10 + $0x30] sm:$0xff]  ;;  %v757_v40 = vld [vmem:[#allocation10 + $0x20] sm:$0xff] }
  0x2d   :  { %595 = vmatmul.msk.bf16.vlgmr.msra.gmra.mxu0 %vm171_vm2, %v162_v18  ;;  %596 = vmatmul.msk.bf16.vlgmr.msra.gmra.mxu1 %vm171_vm2, %v162_v18  ;;  %v764_v41 = vld [vmem:[#allocation12 + $0x18] sm:$0xff]  ;;  %v763_v44 = vld [vmem:[#allocation12 + $0x10] sm:$0xff]  ;;  %v762_v0 = vld [vmem:[#allocation12 + $0x8] sm:$0xff] }
  0x2e   :  { %328 = vmatpush.bf16.msrb.mxu0 %v744_v14  ;;  %411 = vmatpush.bf16.msrb.mxu1 %v752_v15  ;;  %v756_v42 = vld [vmem:[#allocation10 + $0x18] sm:$0xff]  ;;  %v755_v45 = vld [vmem:[#allocation10 + $0x10] sm:$0xff]  ;;  %v754_v1 = vld [vmem:[#allocation10 + $0x8] sm:$0xff] }
  0x2f   :  { %567 = vmatpush.bf16.msrb.mxu3 %v760_v34  ;;  %v248_v43 = vld [vmem:[#allocation2] sm:$0x3]  ;;  %v761_v2 = vld [vmem:[#allocation12] sm:$0xff]  ;;  %v779_v4 = vld [vmem:[#allocation6] ss:$0 sm:$0xff] }
  0x30   :  { %507 = vmatpush.bf16.msrb.mxu2 %v767_v35  ;;  %v250_v48 = vperm.slane %v248_v43, 0  ;;  %v251_v51 = vperm.slane %v248_v43, 1  ;;  %v753_v3 = vld [vmem:[#allocation10] sm:$0xff]  ;;  %v780_v5 = vld [vmem:[#allocation9] ss:$0 sm:$0xff] }
  0x31   :  { %v781_v17 = vld [vmem:[#allocation13] ss:$0 sm:$0xff] }
  0x32   :  { %329 = vmatpush.bf16.msrb.mxu0 %v743_v19  ;;  %412 = vmatpush.bf16.msrb.mxu1 %v751_v20 }
  0x33   :  { %568 = vmatpush.bf16.msrb.mxu3 %v759_v36 }
  0x34   :  { %508 = vmatpush.bf16.msrb.mxu2 %v766_v37 }
  0x36   :  { %330 = vmatpush.bf16.msrb.mxu0 %v742_v21  ;;  %413 = vmatpush.bf16.msrb.mxu1 %v750_v22 }
  0x37   :  { %569 = vmatpush.bf16.msrb.mxu3 %v758_v38 }
  0x38   :  { %509 = vmatpush.bf16.msrb.mxu2 %v765_v39 }
  0x3a   :  { %331 = vmatpush.bf16.msrb.mxu0 %v741_v23  ;;  %414 = vmatpush.bf16.msrb.mxu1 %v749_v24 }
  0x3b   :  { %570 = vmatpush.bf16.msrb.mxu3 %v757_v40 }
  0x3c   :  { %510 = vmatpush.bf16.msrb.mxu2 %v764_v41 }
  0x3e   :  { %332 = vmatpush.bf16.msrb.mxu0 %v740_v25  ;;  %415 = vmatpush.bf16.msrb.mxu1 %v748_v26 }
  0x3f   :  { %571 = vmatpush.bf16.msrb.mxu3 %v756_v42 }
  0x40   :  { %511 = vmatpush.bf16.msrb.mxu2 %v763_v44 }
  0x42   :  { %333 = vmatpush.bf16.msrb.mxu0 %v739_v27  ;;  %416 = vmatpush.bf16.msrb.mxu1 %v747_v28 }
  0x43   :  { %572 = vmatpush.bf16.msrb.mxu3 %v755_v45 }
  0x44   :  { %512 = vmatpush.bf16.msrb.mxu2 %v762_v0 }
  0x46   :  { %334 = vmatpush.bf16.msrb.mxu0 %v738_v29  ;;  %417 = vmatpush.bf16.msrb.mxu1 %v746_v30 }
  0x47   :  { %573 = vmatpush.bf16.msrb.mxu3 %v754_v1 }
  0x48   :  { %513 = vmatpush.bf16.msrb.mxu2 %v761_v2 }
  0x4a   :  { %335 = vmatpush.bf16.msrb.mxu0 %v737_v31  ;;  %418 = vmatpush.bf16.msrb.mxu1 %v745_v32 }
  0x4b   :  { %574 = vmatpush.bf16.msrb.mxu3 %v753_v3 }
  0xaa   :  { %v191_v46 = vpop.f32.mrf.mxu0  ;;  %v204_v47 = vpop.f32.mrf.mxu1 }
  0xab   :  { %v231_v49 = vpop.f32.mrf.mxu2 }
  0xac   :  { %v232_v50 = vadd.f32 %v231_v49, %v191_v46  ;;  %v244_v52 = vpop.f32.mrf.mxu3 }
  0xad   :  { %v245_v54 = vadd.f32 %v244_v52, %v204_v47 }
  0xae   :  { %v254_v53 = vadd.f32 %v250_v48, %v232_v50 }
  0xaf   :  { %v255_v56 = vadd.f32 %v251_v51, %v245_v54 }
  0xb0   :  { %v256_v55 = vmax.f32 %v254_v53, 0.0 }
  0xb1   :  { %v257_v60 = vmax.f32 %v255_v56, 0.0 }
  0xb2   :  { %v193_v57 = vpop.f32.mrf.mxu0  ;;  %v206_v58 = vpop.f32.mrf.mxu1  ;;  %v258_v59 = vpack.c.bf16 %v256_v55, %v256_v55 }
  0xb3   :  { %v233_v61 = vpop.f32.mrf.mxu2  ;;  %v259_v62 = vpack.c.bf16 %v257_v60, %v257_v60 }
  0xb4   :  { %336 = vmatmul.bf16.vlgmr.msrb.gmra.mxu0 %v258_v59  ;;  %v246_v63 = vpop.f32.mrf.mxu3 }
  0xb5   :  { %419 = vmatmul.bf16.vlgmr.msrb.gmra.mxu1 %v259_v62 }
 0x131   :  { %v337_v6 = vpop.f32.mrf.mxu0 }
 0x132   :  { %v338_v7 = vadd.f32 %v779_v4, %v337_v6  ;;  %v420_v8 = vpop.f32.mrf.mxu1 }
 0x133   :  { %v421_v10 = vadd.f32 %v780_v5, %v420_v8 }
 0x134   :  { %v341_v9 = vmax.f32 %v338_v7, 0.0 }
 0x135   :  { %v424_v12 = vmax.f32 %v421_v10, 0.0 }
 0x136   :  { %v342_v11 = vpack.c.bf16 %v341_v9, %v341_v9 }
 0x137   :  { %v425_v13 = vpack.c.bf16 %v424_v12, %v424_v12 }
 0x138   :  { %575 = vmatmul.bf16.vlgmr.msrb.gmra.mxu3 %v342_v11 }
 0x139   :  { %v339_v14 = vpop.f32.mrf.mxu0  ;;  %514 = vmatmul.bf16.vlgmr.msrb.gmra.mxu2 %v425_v13 }
 0x13a   :  { %v422_v15 = vpop.f32.mrf.mxu1 }
 0x1bb   :  { %v576_v16 = vpop.f32.mrf.mxu3 }
 0x1bc   :  { %v515_v18 = vpop.f32.mrf.mxu2 }
 0x1bd   :  { %v577_v19 = vadd.f32 %v576_v16, %v515_v18 }
 0x1bf   :  { %v584_v20 = vadd.f32 %v781_v17, %v577_v19 }
 0x1c1   :  { %585 = vst [vmem:[%s1131_s12] sm:$0xff] %v584_v20 }
 0x1c3   :  { %v578_v21 = vpop.f32.mrf.mxu3 }
 0x1c4   :  { %v517_v22 = vpop.f32.mrf.mxu2 }
 0x1c5   :  { %590 = vsyncpa [#allocation3], 1 }
 0x1c6   :  { %591 = vsyncpa [#allocation5], 1 }
 0x1c7   :  { %592 = vsyncpa [#allocation8], 1 }
 0x1c8   :  { %593 = vsyncpa [#allocation11], 1 }
 0x1c9   :  { %594 = vsyncpa [#allocation14], 1 }

</bundles_post_ra>
